<compile_context>
chip_gen: v7x
topology: tpu7x:2x2x1
jax: 0.10.0
libtpu: 0.0.40
codegen_flags: <defaults>
</compile_context>

<pallas_src>
import math

import numpy as np
import jax
import jax.numpy as jnp
from jax import lax
from jax.experimental import pallas as pl
from jax.experimental.pallas import tpu as pltpu


def _round_up(x, m):
    return (x + m - 1) // m * m


# ----------------------------------------------------------------------------
# Kernel: one (tm, tn) output tile accumulated over the K grid axis.
#   x_ref: (tm, tk)   activations (compute dtype)
#   w_ref: (tn, tk)   dense weight (compute dtype)
#   m_ref: (tn, tk)   binary mask, int8
#   b_ref: (1, tn)    bias, f32
#   o_ref: (tm, tn)   output (out dtype)
#   acc  : (tm, tn)   f32 VMEM accumulator scratch
# ----------------------------------------------------------------------------
def masked_linear_kernel(x_ref, w_ref, m_ref, b_ref, o_ref, acc_ref):
    k = pl.program_id(2)

    @pl.when(k == 0)
    def _():
        acc_ref[...] = jnp.zeros_like(acc_ref)

    # Apply the sparsity mask to this weight tile (int8 -> compute dtype).
    mw = w_ref[...] * m_ref[...].astype(w_ref.dtype)

    # x (tm, tk) . mw (tn, tk), contracting K with K: MXU consumes the weight
    # tile as a transposed RHS operand, no explicit .T / relayout.
    acc_ref[...] += lax.dot_general(
        x_ref[...], mw,
        dimension_numbers=(((1,), (1,)), ((), ())),
        preferred_element_type=jnp.float32)

    @pl.when(k == pl.num_programs(2) - 1)
    def _():
        o_ref[...] = (acc_ref[...] + b_ref[...].astype(jnp.float32)).astype(o_ref.dtype)


# ----------------------------------------------------------------------------
# Wrapper: pad/tile, launch the pipelined pallas_call, slice the result.
# ----------------------------------------------------------------------------
def masked_linear(x, weight, mask, bias, *, compute_dtype=None,
                  tm_max=256, tn_max=256, tk_max=256):
    """x: (B, S, K); weight/mask: (N, K); bias: (N,). Returns (B, S, N)."""
    B, S, K = x.shape
    N, Kw = weight.shape
    assert Kw == K
    M = B * S

    out_dtype = x.dtype
    if compute_dtype is None:
        compute_dtype = x.dtype

    # Tile sizes: MXU/lane friendly, capped so the double-buffered working set
    # fits comfortably in scoped VMEM on every generation (incl. v7x 64 MiB).
    tm = min(tm_max, _round_up(M, 8))
    tn = min(tn_max, _round_up(N, 128))
    tk = min(tk_max, _round_up(K, 128))

    Mp = _round_up(M, tm)
    Np = _round_up(N, tn)
    Kp = _round_up(K, tk)

    x2d = x.reshape(M, K).astype(compute_dtype)
    w = weight.astype(compute_dtype)
    m8 = mask.astype(jnp.int8)                  # shrink mask HBM stream 4x vs f32
    b2d = bias.reshape(1, N).astype(jnp.float32)

    if (Mp, Kp) != (M, K):
        x2d = jnp.pad(x2d, ((0, Mp - M), (0, Kp - K)))
    if (Np, Kp) != (N, K):
        w = jnp.pad(w, ((0, Np - N), (0, Kp - K)))
        m8 = jnp.pad(m8, ((0, Np - N), (0, Kp - K)))
    if Np != N:
        b2d = jnp.pad(b2d, ((0, 0), (0, Np - N)))

    grid = (Mp // tm, Np // tn, Kp // tk)

    itemsize = jnp.dtype(compute_dtype).itemsize
    cost = pl.CostEstimate(
        flops=2 * Mp * Np * Kp,
        transcendentals=0,
        bytes_accessed=(Mp * Kp * itemsize          # x
                        + Np * Kp * itemsize        # weight
                        + Np * Kp * 1               # int8 mask
                        + Np * 4                    # bias
                        + Mp * Np * jnp.dtype(out_dtype).itemsize))

    out = pl.pallas_call(
        masked_linear_kernel,
        out_shape=jax.ShapeDtypeStruct((Mp, Np), out_dtype),
        grid_spec=pltpu.PrefetchScalarGridSpec(
            num_scalar_prefetch=0,
            grid=grid,
            in_specs=[
                pl.BlockSpec((tm, tk), lambda i, j, k: (i, k)),   # x tile
                pl.BlockSpec((tn, tk), lambda i, j, k: (j, k)),   # weight tile
                pl.BlockSpec((tn, tk), lambda i, j, k: (j, k)),   # mask tile (int8)
                pl.BlockSpec((1, tn), lambda i, j, k: (0, j)),    # bias tile
            ],
            out_specs=pl.BlockSpec((tm, tn), lambda i, j, k: (i, j)),
            scratch_shapes=[pltpu.VMEM((tm, tn), jnp.float32)],
        ),
        compiler_params=pltpu.CompilerParams(
            dimension_semantics=("parallel", "parallel", "arbitrary")),
        cost_estimate=cost,
    )(x2d, w, m8, b2d)

    return out[:M, :N].reshape(B, S, N)


# ----------------------------------------------------------------------------
# Parameter / buffer construction (mirrors MaskLinear.__init__ / reset_parameters
# and MaskLinearWrap bias init).
# ----------------------------------------------------------------------------
def build_sparse_mask(in_features, out_features, window_size=6, stripes=3, step=1):
    pseudo = (min(in_features, out_features), max(in_features, out_features))
    tmp = np.zeros(pseudo, dtype=np.float32)
    stride = int(math.sqrt(pseudo[0]))
    d = math.ceil(pseudo[1] / pseudo[0])
    for k in range(stripes):
        ps = stride * k
        for i in range(0, pseudo[0], window_size):
            tmp[ps + i: ps + i + window_size, i * d: i * d + step * d * window_size] = 1
    for k in range(stripes):
        ps = stride * k
        for i in range(0, pseudo[0], window_size):
            tmp[i: i + window_size, (i + ps) * d: (ps + i) * d + step * d * window_size] = 1
    if in_features <= out_features:
        sparse_mask = tmp.T            # (out, in)
    else:
        sparse_mask = tmp              # (out, in)
    return jnp.asarray(sparse_mask, dtype=jnp.float32)


def init_params(key, in_features, out_features, sparse_mask):
    k_w, k_b = jax.random.split(key)
    # kaiming_uniform_(a=sqrt(5)) on (out, in): bound = 1/sqrt(fan_in)
    bound_w = 1.0 / math.sqrt(in_features)
    weight = jax.random.uniform(k_w, (out_features, in_features),
                                dtype=jnp.float32, minval=-bound_w, maxval=bound_w)
    # scale by sqrt(sum(sparse_mask)/(in*out))
    scale = jnp.sqrt(jnp.sum(sparse_mask) / (in_features * out_features))
    weight = weight / scale
    # bias: uniform(-1/sqrt(fan_in), 1/sqrt(fan_in))
    bound_b = 1.0 / math.sqrt(in_features)
    bias = jax.random.uniform(k_b, (out_features,),
                              dtype=jnp.float32, minval=-bound_b, maxval=bound_b)
    return weight, bias


# ----------------------------------------------------------------------------
# Main
# ----------------------------------------------------------------------------
if __name__ == "__main__":
    in_features = 32
    out_features = 48
    B, S = 2, 8

    key = jax.random.PRNGKey(0)
    k_x, k_p = jax.random.split(key)

    sparse_mask = build_sparse_mask(in_features, out_features)
    sparse_mask_topk = jnp.zeros((out_features, in_features), dtype=jnp.float32)
    # mask = (topk | sparse).int() — topk buffer is zero at init (hook fires only on backward)
    mask = jnp.logical_or(sparse_mask_topk.astype(bool),
                          sparse_mask.astype(bool)).astype(jnp.float32)

    weight, bias = init_params(k_p, in_features, out_features, sparse_mask)
    x = jax.random.normal(k_x, (B, S, in_features), dtype=jnp.float32)

    # --- f32 path: exact match against the PyTorch-equivalent reference -----
    y = masked_linear(x, weight, mask, bias)
    y = jax.block_until_ready(y)
    y_ref = x @ (mask * weight).T + bias
    np.testing.assert_allclose(np.asarray(y), np.asarray(y_ref), rtol=1e-5, atol=1e-5)

    # --- bf16 MXU path: compare against a matched bf16 reference ------------
    y_bf16 = masked_linear(x, weight, mask, bias, compute_dtype=jnp.bfloat16)
    y_bf16 = jax.block_until_ready(y_bf16)
    xb = x.astype(jnp.bfloat16)
    mwb = (mask * weight).astype(jnp.bfloat16)
    y_ref_bf16 = jnp.einsum('bsk,nk->bsn', xb, mwb,
                            preferred_element_type=jnp.float32) + bias
    np.testing.assert_allclose(np.asarray(y_bf16), np.asarray(y_ref_bf16),
                               rtol=1e-4, atol=1e-4)

    print("KERNEL_OK")
</pallas_src>

<mosaic_0001>
module attributes {stable_mosaic.version = 11 : i64} {
  func.func @masked_linear_kernel(%arg0: i32, %arg1: i32, %arg2: i32, %arg3: memref<16x128xf32, #tpu.memory_space<vmem>>, %arg4: memref<128x128xf32, #tpu.memory_space<vmem>>, %arg5: memref<128x128xi8, #tpu.memory_space<vmem>>, %arg6: memref<1x128xf32, #tpu.memory_space<vmem>>, %arg7: memref<16x128xf32, #tpu.memory_space<vmem>>, %arg8: memref<16x128xf32, #tpu.memory_space<vmem>>) attributes {dimension_semantics = [#tpu.dimension_semantics<parallel>, #tpu.dimension_semantics<parallel>, #tpu.dimension_semantics<arbitrary>], iteration_bounds = array<i64: 1, 1, 1>, scalar_prefetch = 0 : i64, scratch_operands = 1 : i64, tpu.core_type = #tpu.core_type<tc>, window_params = [{transform_indices = @transform_0, window_bounds = array<i64: 16, 128>}, {transform_indices = @transform_1, window_bounds = array<i64: 128, 128>}, {transform_indices = @transform_2, window_bounds = array<i64: 128, 128>}, {transform_indices = @transform_3, window_bounds = array<i64: 1, 128>}, {transform_indices = @transform_4, window_bounds = array<i64: 16, 128>}]} {
    %c0_i32 = arith.constant 0 : i32
    %0 = arith.cmpi eq, %arg2, %c0_i32 : i32
    %1 = arith.extui %0 : i1 to i32
    %c0_i32_0 = arith.constant 0 : i32
    %2 = arith.cmpi ne, %1, %c0_i32_0 : i32
    scf.if %2 {
      %cst_12 = arith.constant 0.000000e+00 : f32
      %15 = vector.broadcast %cst_12 : f32 to vector<16x128xf32>
      %c0_13 = arith.constant 0 : index
      %c0_14 = arith.constant 0 : index
      %16 = vector.load %arg8[%c0_13, %c0_14] : memref<16x128xf32, #tpu.memory_space<vmem>>, vector<16x128xf32>
      tpu.vector_store %arg8[%c0_13, %c0_14], %15 {strides = array<i32>} : memref<16x128xf32, #tpu.memory_space<vmem>>, vector<16x128xf32>,
    } else {
    }
    %c0 = arith.constant 0 : index
    %c0_1 = arith.constant 0 : index
    %3 = vector.load %arg4[%c0, %c0_1] : memref<128x128xf32, #tpu.memory_space<vmem>>, vector<128x128xf32>
    %c0_2 = arith.constant 0 : index
    %c0_3 = arith.constant 0 : index
    %4 = vector.load %arg5[%c0_2, %c0_3] : memref<128x128xi8, #tpu.memory_space<vmem>>, vector<128x128xi8>
    %5 = arith.sitofp %4 : vector<128x128xi8> to vector<128x128xf32>
    %6 = arith.mulf %3, %5 : vector<128x128xf32>
    %c0_4 = arith.constant 0 : index
    %c0_5 = arith.constant 0 : index
    %7 = vector.load %arg8[%c0_4, %c0_5] : memref<16x128xf32, #tpu.memory_space<vmem>>, vector<16x128xf32>
    %c0_6 = arith.constant 0 : index
    %c0_7 = arith.constant 0 : index
    %8 = vector.load %arg3[%c0_6, %c0_7] : memref<16x128xf32, #tpu.memory_space<vmem>>, vector<16x128xf32>
    %cst = arith.constant dense<0.000000e+00> : vector<16x128xf32>
    %9 = tpu.matmul %8, %6, %cst {dimension_numbers = #tpu.dot_dimension_numbers<[1], [1], [0], [0], [0, 0, 1, 0], [], []>} : vector<16x128xf32>, vector<128x128xf32>, vector<16x128xf32> -> vector<16x128xf32>
    %10 = arith.addf %7, %9 : vector<16x128xf32>
    %c0_8 = arith.constant 0 : index
    %c0_9 = arith.constant 0 : index
    %11 = vector.load %arg8[%c0_8, %c0_9] : memref<16x128xf32, #tpu.memory_space<vmem>>, vector<16x128xf32>
    tpu.vector_store %arg8[%c0_8, %c0_9], %10 {strides = array<i32>} : memref<16x128xf32, #tpu.memory_space<vmem>>, vector<16x128xf32>,
    %c0_i32_10 = arith.constant 0 : i32
    %12 = arith.cmpi eq, %arg2, %c0_i32_10 : i32
    %13 = arith.extui %12 : i1 to i32
    %c0_i32_11 = arith.constant 0 : i32
    %14 = arith.cmpi ne, %13, %c0_i32_11 : i32
    scf.if %14 {
      %c0_12 = arith.constant 0 : index
      %c0_13 = arith.constant 0 : index
      %15 = vector.load %arg8[%c0_12, %c0_13] : memref<16x128xf32, #tpu.memory_space<vmem>>, vector<16x128xf32>
      %c0_14 = arith.constant 0 : index
      %c0_15 = arith.constant 0 : index
      %16 = vector.load %arg6[%c0_14, %c0_15] : memref<1x128xf32, #tpu.memory_space<vmem>>, vector<1x128xf32>
      %17 = vector.broadcast %16 : vector<1x128xf32> to vector<16x128xf32>
      %18 = arith.addf %15, %17 : vector<16x128xf32>
      %c0_16 = arith.constant 0 : index
      %c0_17 = arith.constant 0 : index
      %19 = vector.load %arg7[%c0_16, %c0_17] : memref<16x128xf32, #tpu.memory_space<vmem>>, vector<16x128xf32>
      tpu.vector_store %arg7[%c0_16, %c0_17], %18 {strides = array<i32>} : memref<16x128xf32, #tpu.memory_space<vmem>>, vector<16x128xf32>,
    } else {
    }
    return
  }
  func.func @transform_0(%arg0: i32, %arg1: i32, %arg2: i32) -> (i32, i32) {
    %c0_i32 = arith.constant 0 : i32
    return %arg0, %arg2 : i32, i32
  }
  func.func @transform_1(%arg0: i32, %arg1: i32, %arg2: i32) -> (i32, i32) {
    %c0_i32 = arith.constant 0 : i32
    return %arg1, %arg2 : i32, i32
  }
  func.func @transform_2(%arg0: i32, %arg1: i32, %arg2: i32) -> (i32, i32) {
    %c0_i32 = arith.constant 0 : i32
    return %arg1, %arg2 : i32, i32
  }
  func.func @transform_3(%arg0: i32, %arg1: i32, %arg2: i32) -> (i32, i32) {
    %c0_i32 = arith.constant 0 : i32
    %c0_i32_0 = arith.constant 0 : i32
    return %c0_i32, %arg1 : i32, i32
  }
  func.func @transform_4(%arg0: i32, %arg1: i32, %arg2: i32) -> (i32, i32) {
    %c0_i32 = arith.constant 0 : i32
    return %arg0, %arg1 : i32, i32
  }
}

</mosaic_0001>

<bundles_post_ra>
// kernel: tpu_custom_call.1
= control target key start
LH: loop header
LB: loop body
LE: loop exit
PB: predicated region body
PF: predicated region fallthrough
CT: control target
= control target key end

     0   :  { %9 = vsyncpa [#allocation4], 0  ;;  %s537_s0 = inlined_call_operand.hbm [shape: f32[16,128], index: 0, kind: input, shape index: {}]   ;;  %s538_s1 = inlined_call_operand.hbm [shape: f32[128,128], index: 1, kind: input, shape index: {}]   ;;  %s539_s2 = inlined_call_operand.hbm [shape: s8[128,128], index: 2, kind: input, shape index: {}]   ;;  %s540_s3 = inlined_call_operand.vmem [shape: f32[1,128], index: 3, kind: input, shape index: {}]   ;;  %s541_s4 = inlined_call_operand.hbm [shape: f32[16,128], index: 4, kind: output, shape index: {}]  }
   0x1   :  { %10 = vsyncpa [#allocation7], 0 }
   0x2   :  { %11 = vsyncpa [#allocation5], 0  ;;  %s436_s15 = smov [#allocation6]   ;;  %s437_s17 = smov [#allocation3]  }
   0x3   :  { %s29_s16 = sshll.u32 %s436_s15, 4  ;;  %s17_s18 = sshll.u32 %s437_s17, 4  ;;  %s30_s16 = int_to_ptr.vmem [resolvable:$true] %s29_s16  ;;  %s467_s18 = int_to_ptr.vmem [resolvable:$true] %s17_s18 }
   0x4   :  { %s342_s21 = scalar_lea.hbm %s538_s1, 2048 }
   0x5   :  { %p343_p0 = scmp.ne.s32.totalorder %s538_s1, %s342_s21  ;;  %p346_p1 = scmp.lt.u32.totalorder %s342_s21, %s538_s1 }
   0x7   :  { %p348_p2 = pnand %p346_p1, %p343_p0 }
   0x9   :  { %351 = shalt.err (!%p348_p2)
}
   0xa   :  { %s352_s26 = scalar_lea.vmem %s30_s16, 2048  ;;  %p357_p4 = scmp.lt.s32.totalorder %s30_s16, %s30_s16 }
   0xb   :  { %p353_p3 = scmp.ne.s32.totalorder %s30_s16, %s352_s26  ;;  %p358_p5 = scmp.lt.s32.totalorder %s352_s26, %s352_s26 }
   0xd   :  { %p359_p6 = por %p358_p5, %p357_p4 }
   0xf   :  { %p360_p7 = pnand %p359_p6, %p353_p3 }
  0x11   :  { %363 = shalt.err (!%p360_p7)
}
  0x12   :  { %s438_s27 = smov 128   ;;  %s439_s28 = smov 8  }
  0x13   :  { %35 = dma.hbm_to_vmem [thread:$0]  %s538_s1, 2048, %s30_s16, [#allocation7], %s438_s27, %s438_s27, %s439_s28  }
  0x14   :  { %s364_s7 = scalar_lea.hbm %s537_s0, 256 }
  0x15   :  { %p365_p8 = scmp.ne.s32.totalorder %s537_s0, %s364_s7  ;;  %p368_p9 = scmp.lt.u32.totalorder %s364_s7, %s537_s0 }
  0x17   :  { %p370_p10 = pnand %p368_p9, %p365_p8 }
  0x19   :  { %373 = shalt.err (!%p370_p10)
}
  0x1a   :  { %s374_s12 = scalar_lea.vmem %s467_s18, 256  ;;  %p379_p12 = scmp.lt.s32.totalorder %s467_s18, %s467_s18 }
  0x1b   :  { %p375_p11 = scmp.ne.s32.totalorder %s467_s18, %s374_s12  ;;  %p380_p13 = scmp.lt.s32.totalorder %s374_s12, %s374_s12 }
  0x1d   :  { %p381_p0 = por %p380_p13, %p379_p12 }
  0x1f   :  { %p382_p1 = pnand %p381_p0, %p375_p11 }
  0x21   :  { %385 = shalt.err (!%p382_p1)
}
  0x22   :  { %23 = dma.hbm_to_vmem [thread:$0]  %s537_s0, 256, %s467_s18, [#allocation4], %s438_s27, %s438_s27, %s439_s28  }
  0x23   :  { %s440_s14 = smov [#allocation8]   ;;  %s386_s19 = scalar_lea.hbm %s539_s2, 512 }
  0x24   :  { %s41_s15 = sshll.u32 %s440_s14, 4  ;;  %p387_p2 = scmp.ne.s32.totalorder %s539_s2, %s386_s19  ;;  %s42_s15 = int_to_ptr.vmem [resolvable:$true] %s41_s15 }
  0x25   :  { %p390_p3 = scmp.lt.u32.totalorder %s386_s19, %s539_s2 }
  0x27   :  { %p392_p4 = pnand %p390_p3, %p387_p2 }
  0x29   :  { %395 = shalt.err (!%p392_p4)
}
  0x2a   :  { %s396_s24 = scalar_lea.vmem %s42_s15, 512  ;;  %p401_p6 = scmp.lt.s32.totalorder %s42_s15, %s42_s15 }
  0x2b   :  { %p397_p5 = scmp.ne.s32.totalorder %s42_s15, %s396_s24  ;;  %p402_p7 = scmp.lt.s32.totalorder %s396_s24, %s396_s24 }
  0x2d   :  { %p403_p8 = por %p402_p7, %p401_p6 }
  0x2f   :  { %p404_p9 = pnand %p403_p8, %p397_p5 }
  0x31   :  { %407 = shalt.err (!%p404_p9)
}
  0x32   :  { %47 = dma.hbm_to_vmem [thread:$0]  %s539_s2, 512, %s42_s15, [#allocation7], %s438_s27, %s438_s27, %s439_s28  }
  0x33   :  { %430 = dma.done.wait [#allocation4], 256  }
  0x34   :  { %431 = vsyncadd [#allocation4], 4294967040 }
  0x35   :  { %432 = dma.done.wait [#allocation7], 2560  }
  0x36   :  { %433 = vsyncadd [#allocation7], 4294964736  ;;  %v81_v0 = vld [vmem:[#allocation8] sm:$0xff]  ;;  %v66_v2 = vld [vmem:[#allocation6 + $0x8] sm:$0xff]  ;;  %s441_s26 = smov [#allocation9]  }
  0x37   :  { %v65_v1 = vld [vmem:[#allocation6] sm:$0xff]  ;;  %v85_v3 = vunpack.c.0.s8 %v81_v0  ;;  %v86_v4 = vunpack.c.1.s8 %v81_v0  ;;  %v87_v5 = vunpack.c.2.s8 %v81_v0  ;;  %v88_v6 = vunpack.c.3.s8 %v81_v0  ;;  %v67_v7 = vld [vmem:[#allocation6 + $0x10] sm:$0xff]  ;;  %v68_v8 = vld [vmem:[#allocation6 + $0x18] sm:$0xff]  ;;  %s237_s29 = sshll.u32 %s441_s26, 4  ;;  %s238_s29 = int_to_ptr.vmem [resolvable:$true] %s237_s29 }
  0x38   :  { %v82_v9 = vld [vmem:[#allocation8 + $0x8] sm:$0xff]  ;;  %v135_v20 = vld [vmem:[#allocation3] sm:$0xff]  ;;  %v69_v25 = vld [vmem:[#allocation6 + $0x20] sm:$0xff]  ;;  %s408_s30 = scalar_lea.vmem %s238_s29, 256  ;;  %p413_p11 = scmp.lt.s32.totalorder %s238_s29, %s238_s29 }
  0x39   :  { %v101_v10 = vcvt.s32.f32 %v85_v3  ;;  %v102_v11 = vcvt.s32.f32 %v86_v4  ;;  %v103_v12 = vcvt.s32.f32 %v87_v5  ;;  %v104_v13 = vcvt.s32.f32 %v88_v6  ;;  %301 = vmatprep.mubr.f32.mxu0 %v135_v20  ;;  %v70_v26 = vld [vmem:[#allocation6 + $0x28] sm:$0xff]  ;;  %v71_v34 = vld [vmem:[#allocation6 + $0x30] sm:$0xff]  ;;  %v72_v35 = vld [vmem:[#allocation6 + $0x38] sm:$0xff]  ;;  %p409_p10 = scmp.ne.s32.totalorder %s238_s29, %s408_s30  ;;  %p414_p12 = scmp.lt.s32.totalorder %s408_s30, %s408_s30 }
  0x3a   :  { %v89_v14 = vunpack.c.0.s8 %v82_v9  ;;  %v90_v15 = vunpack.c.1.s8 %v82_v9  ;;  %v91_v29 = vunpack.c.2.s8 %v82_v9  ;;  %v92_v30 = vunpack.c.3.s8 %v82_v9  ;;  %v83_v36 = vld [vmem:[#allocation8 + $0x10] sm:$0xff]  ;;  %v73_v44 = vld [vmem:[#allocation6 + $0x40] sm:$0xff]  ;;  %v74_v45 = vld [vmem:[#allocation6 + $0x48] sm:$0xff] }
  0x3b   :  { %v117_v16 = vmul.f32 %v101_v10, %v65_v1  ;;  %v118_v17 = vmul.f32 %v102_v11, %v66_v2  ;;  %v119_v18 = vmul.f32 %v103_v12, %v67_v7  ;;  %v120_v19 = vmul.f32 %v104_v13, %v68_v8  ;;  %v75_v53 = vld [vmem:[#allocation6 + $0x50] sm:$0xff]  ;;  %v76_v54 = vld [vmem:[#allocation6 + $0x58] sm:$0xff]  ;;  %v77_v63 = vld [vmem:[#allocation6 + $0x60] sm:$0xff]  ;;  %p415_p13 = por %p414_p12, %p413_p11 }
  0x3c   :  { %v105_v23 = vcvt.s32.f32 %v89_v14  ;;  %v106_v24 = vcvt.s32.f32 %v90_v15  ;;  %v107_v32 = vcvt.s32.f32 %v91_v29  ;;  %v108_v33 = vcvt.s32.f32 %v92_v30  ;;  %v84_v55 = vld [vmem:[#allocation8 + $0x18] sm:$0xff]  ;;  %v78_v0 = vld [vmem:[#allocation6 + $0x68] sm:$0xff]  ;;  %v79_v8 = vld [vmem:[#allocation6 + $0x70] sm:$0xff] }
  0x3d   :  { %v304_v21 = vpack.c.bf16 %v118_v17, %v117_v16  ;;  %v308_v22 = vpack.c.bf16 %v120_v19, %v119_v18  ;;  %v93_v39 = vunpack.c.0.s8 %v83_v36  ;;  %v94_v40 = vunpack.c.1.s8 %v83_v36  ;;  %v80_v9 = vld [vmem:[#allocation6 + $0x78] sm:$0xff]  ;;  %v250_v14 = vld [vmem:[%s540_s3] ss:$0 sm:$0xff]  ;;  %p416_p0 = pnand %p415_p13, %p409_p10 }
  0x3e   :  { %v121_v27 = vmul.f32 %v105_v23, %v69_v25  ;;  %v122_v28 = vmul.f32 %v106_v24, %v70_v26  ;;  %v123_v37 = vmul.f32 %v107_v32, %v71_v34  ;;  %v124_v38 = vmul.f32 %v108_v33, %v72_v35  ;;  %v136_v13 = vld [vmem:[#allocation3 + $0x8] sm:$0xff] }
  0x3f   :  { %305 = vmatprep.subr.bf16.mxu0 %v304_v21  ;;  %v109_v42 = vcvt.s32.f32 %v93_v39  ;;  %v110_v43 = vcvt.s32.f32 %v94_v40  ;;  %v95_v48 = vunpack.c.2.s8 %v83_v36  ;;  %v96_v49 = vunpack.c.3.s8 %v83_v36 }
  0x40   :  { %307 = vmatpush3.bf16.xpose.msra.mxu0 %v304_v21  ;;  %v312_v31 = vpack.c.bf16 %v122_v28, %v121_v27  ;;  %v316_v41 = vpack.c.bf16 %v124_v38, %v123_v37  ;;  %v97_v58 = vunpack.c.0.s8 %v84_v55  ;;  %v98_v59 = vunpack.c.1.s8 %v84_v55 }
  0x41   :  { %309 = vmatprep.subr.bf16.mxu0 %v308_v22  ;;  %v125_v46 = vmul.f32 %v109_v42, %v73_v44  ;;  %v126_v47 = vmul.f32 %v110_v43, %v74_v45  ;;  %v111_v51 = vcvt.s32.f32 %v95_v48  ;;  %v112_v52 = vcvt.s32.f32 %v96_v49 }
  0x42   :  { %v113_v61 = vcvt.s32.f32 %v97_v58  ;;  %v114_v62 = vcvt.s32.f32 %v98_v59  ;;  %v99_v3 = vunpack.c.2.s8 %v84_v55  ;;  %v100_v4 = vunpack.c.3.s8 %v84_v55 }
  0x43   :  { %v320_v50 = vpack.c.bf16 %v126_v47, %v125_v46  ;;  %v127_v56 = vmul.f32 %v111_v51, %v75_v53  ;;  %v128_v57 = vmul.f32 %v112_v52, %v76_v54 }
  0x44   :  { %v129_v1 = vmul.f32 %v113_v61, %v77_v63  ;;  %v130_v2 = vmul.f32 %v114_v62, %v78_v0  ;;  %v115_v6 = vcvt.s32.f32 %v99_v3  ;;  %v116_v7 = vcvt.s32.f32 %v100_v4 }
  0x45   :  { %v324_v60 = vpack.c.bf16 %v128_v57, %v127_v56 }
  0x46   :  { %v328_v5 = vpack.c.bf16 %v130_v2, %v129_v1  ;;  %v131_v10 = vmul.f32 %v115_v6, %v79_v8  ;;  %v132_v11 = vmul.f32 %v116_v7, %v80_v9 }
  0x48   :  { %311 = vmatpush3.bf16.xpose.msra.mxu0 %v308_v22  ;;  %v332_v12 = vpack.c.bf16 %v132_v11, %v131_v10 }
  0x49   :  { %313 = vmatprep.subr.bf16.mxu0 %v312_v31 }
  0x50   :  { %315 = vmatpush3.bf16.xpose.msra.mxu0 %v312_v31 }
  0x51   :  { %317 = vmatprep.subr.bf16.mxu0 %v316_v41 }
  0x58   :  { %319 = vmatpush3.bf16.xpose.msra.mxu0 %v316_v41 }
  0x59   :  { %321 = vmatprep.subr.bf16.mxu0 %v320_v50 }
  0x60   :  { %323 = vmatpush3.bf16.xpose.msra.mxu0 %v320_v50 }
  0x61   :  { %325 = vmatprep.subr.bf16.mxu0 %v324_v60 }
  0x68   :  { %327 = vmatpush3.bf16.xpose.msra.mxu0 %v324_v60 }
  0x69   :  { %329 = vmatprep.subr.bf16.mxu0 %v328_v5 }
  0x70   :  { %331 = vmatpush3.bf16.xpose.msra.mxu0 %v328_v5 }
  0x71   :  { %333 = vmatprep.subr.bf16.mxu0 %v332_v12 }
  0x78   :  { %335 = vmatpush3.bf16.xpose.msra.mxu0 %v332_v12 }
  0x7f   :  { %302 = vmatmul.mubr.f32.vlgmr.msra.gmra.mrb[0].mxu0 %v136_v13 }
 0x152   :  { %v303_v15 = vpop.f32.mrb[0].mxu0 }
 0x153   :  { %v229_v16 = vadd.f32 %v303_v15, %v250_v14  ;;  %v203_v17 = vpop.f32.mrb[1].mxu0 }
 0x154   :  { %v228_v18 = vadd.f32 %v250_v14, %v203_v17 }
 0x155   :  { %231 = vst [vmem:[#allocation9 + $0x8] sm:$0xff] %v229_v16 }
 0x156   :  { %230 = vst [vmem:[#allocation9] sm:$0xff] %v228_v18 }
 0x157   :  { %419 = shalt.err (!%p416_p0)
}
 0x158   :  { %s420_s3 = scalar_lea.hbm %s541_s4, 256 }
 0x159   :  { %p421_p1 = scmp.ne.s32.totalorder %s541_s4, %s420_s3  ;;  %p424_p2 = scmp.lt.u32.totalorder %s420_s3, %s541_s4 }
 0x15b   :  { %p426_p3 = pnand %p424_p2, %p421_p1 }
 0x15d   :  { %429 = shalt.err (!%p426_p3)
}
 0x15e   :  { %243 = dma.vmem_to_hbm [thread:$0]  %s238_s29, 256, %s541_s4, [#allocation5], %s438_s27, %s438_s27, %s439_s28  }
 0x15f   :  { %434 = dma.done.wait [#allocation5], 256  }
 0x160   :  { %435 = vsyncadd [#allocation5], 4294967040 }
 0x161   :  { %247 = vsyncpa [#allocation4], 1 }
 0x162   :  { %248 = vsyncpa [#allocation7], 1 }
 0x163   :  { %249 = vsyncpa [#allocation5], 1 }

</bundles_post_ra>
